<compile_context>
chip_gen: v7x
topology: tpu7x:2x2x1
jax: 0.10.0
libtpu: 0.0.40
codegen_flags: <defaults>
</compile_context>

<pallas_src>
import functools

import jax
import jax.numpy as jnp
from jax.experimental import pallas as pl
from jax.experimental.pallas import tpu as pltpu


def _round_up(x, m):
    return ((x + m - 1) // m) * m


# ---------------------------------------------------------------------------
# Dropout: elementwise keep/scale driven by precomputed random bits.
# ---------------------------------------------------------------------------
def _dropout_kernel(x_ref, bits_ref, o_ref, *, threshold24, scale):
    # 24-bit uniform integer from the top bits of each uint32; integer compare
    # avoids an int->float convert and a multiply per vreg.
    r = (bits_ref[...] >> 8).astype(jnp.int32)
    keep = r >= jnp.int32(threshold24)
    x = x_ref[...]
    o_ref[...] = jnp.where(keep, x * jnp.asarray(scale, x.dtype), jnp.zeros_like(x))


def pallas_dropout(z, p, key, *, block_rows=256):
    """Inverted dropout matching F.dropout(z, p, training=True)."""
    if p <= 0.0:
        return z
    if p >= 1.0:
        return jnp.zeros_like(z)
    N, D = z.shape
    rows = min(int(block_rows), N)
    assert N % rows == 0, "caller must pass row-aligned z"
    # Streaming kernel: grow the row tile (while it still divides N) to
    # amortize per-step pipeline overhead.
    while rows * 2 <= min(N, 1024) and N % (rows * 2) == 0:
        rows *= 2

    bits = jax.random.bits(key, (N, D), dtype=jnp.uint32)
    threshold24 = int(round(float(p) * (1 << 24)))
    scale = 1.0 / (1.0 - float(p))

    return pl.pallas_call(
        functools.partial(_dropout_kernel, threshold24=threshold24, scale=scale),
        out_shape=jax.ShapeDtypeStruct((N, D), z.dtype),
        grid_spec=pltpu.PrefetchScalarGridSpec(
            num_scalar_prefetch=0,
            grid=(N // rows,),
            in_specs=[
                pl.BlockSpec((rows, D), lambda i: (i, 0)),
                pl.BlockSpec((rows, D), lambda i: (i, 0)),
            ],
            out_specs=pl.BlockSpec((rows, D), lambda i: (i, 0)),
        ),
        compiler_params=pltpu.CompilerParams(
            dimension_semantics=("parallel",),  # tiles independent -> both TCs
        ),
    )(z, bits)


# ---------------------------------------------------------------------------
# Inner-product decoder: adj[i_tile, j_tile] = sigmoid(z_i @ z_j.T)
# ---------------------------------------------------------------------------
def _inner_product_kernel(zi_ref, zj_ref, o_ref, *, tn, resident, cast_bf16):
    zi = zi_ref[...]
    if resident:
        # Whole z is resident in VMEM; slice the j tile locally (no HBM re-read).
        j0 = pl.multiple_of(pl.program_id(1) * tn, tn)
        zj = zj_ref[pl.ds(j0, tn), :]
    else:
        zj = zj_ref[...]
    if cast_bf16:
        zi = zi.astype(jnp.bfloat16)
        zj = zj.astype(jnp.bfloat16)
    # Contract on the last dim of both operands: z_i @ z_j.T without an
    # explicit transpose, so the MXU consumes both tiles directly.
    s = jax.lax.dot_general(
        zi, zj,
        dimension_numbers=(((1,), (1,)), ((), ())),
        preferred_element_type=jnp.float32,
    )
    o_ref[...] = jax.nn.sigmoid(s).astype(o_ref.dtype)


def inner_product_decoder(z, *, dropout=0.0, training=False, key=None,
                          block=256, resident_z=None, use_bf16_operands=False):
    """adj = sigmoid(dropout(z) @ dropout(z).T), matching the PyTorch module."""
    N, D = z.shape

    # Tile size: multiple of 128 (lane-dense output stores), capped by N.
    blk = min(int(block), _round_up(N, 128))
    blk = _round_up(max(blk, 128), 128)
    N_pad = _round_up(N, blk)

    if N_pad != N:
        z = jnp.pad(z, ((0, N_pad - N), (0, 0)))

    if training and dropout > 0.0:
        if key is None:
            key = jax.random.PRNGKey(0)
        z = pallas_dropout(z, dropout, key, block_rows=blk)

    itemsize = jnp.dtype(z.dtype).itemsize
    if resident_z is None:
        # Keep the whole z resident (double-buffered) only if it stays well
        # under the v7x 64 MiB VMEM budget; otherwise stream (blk, D) j-tiles.
        resident_z = 2 * N_pad * D * itemsize <= 16 * 1024 * 1024
    resident_z = bool(resident_z)

    grid = (N_pad // blk, N_pad // blk)
    zi_spec = pl.BlockSpec((blk, D), lambda i, j: (i, 0))
    if resident_z:
        zj_spec = pl.BlockSpec((N_pad, D), lambda i, j: (0, 0))
    else:
        zj_spec = pl.BlockSpec((blk, D), lambda i, j: (j, 0))
    out_spec = pl.BlockSpec((blk, blk), lambda i, j: (i, j))

    # Explicit VMEM budget with headroom (double-buffered tiles + resident z).
    out_bytes = blk * blk * 4 * 2
    zi_bytes = blk * D * itemsize * 2
    zj_bytes = (N_pad if resident_z else blk) * D * itemsize * 2
    vmem_limit = max(out_bytes + zi_bytes + zj_bytes + (4 << 20), 32 << 20)

    kernel = functools.partial(
        _inner_product_kernel,
        tn=blk, resident=resident_z, cast_bf16=bool(use_bf16_operands),
    )

    adj = pl.pallas_call(
        kernel,
        out_shape=jax.ShapeDtypeStruct((N_pad, N_pad), jnp.float32),
        grid_spec=pltpu.PrefetchScalarGridSpec(
            num_scalar_prefetch=0,
            grid=grid,
            in_specs=[zi_spec, zj_spec],
            out_specs=out_spec,
        ),
        compiler_params=pltpu.CompilerParams(
            dimension_semantics=("parallel", "parallel"),
            vmem_limit_bytes=int(vmem_limit),
        ),
    )(z, z)

    if N_pad != N:
        adj = adj[:N, :N]
    return adj


if __name__ == "__main__":
    key = jax.random.PRNGKey(0)
    kz, kz2, kdrop = jax.random.split(key, 3)

    # --- eval mode (dropout is identity), N not a tile multiple -> padding ---
    N, D = 300, 64
    z = jax.random.normal(kz, (N, D), dtype=jnp.float32)
    ref = jax.nn.sigmoid(jnp.dot(z, z.T, precision="highest"))

    adj = inner_product_decoder(z, dropout=0.1, training=False)       # resident-z path
    adj = jax.block_until_ready(adj)
    assert adj.shape == (N, N) and adj.dtype == jnp.float32
    assert float(jnp.max(jnp.abs(adj - ref))) < 2e-3

    adj_tiled = inner_product_decoder(z, dropout=0.1, training=False,
                                      resident_z=False, block=128)    # tiled zj path
    adj_tiled = jax.block_until_ready(adj_tiled)
    assert float(jnp.max(jnp.abs(adj_tiled - ref))) < 2e-3

    # --- training mode: deterministic given key; replay the mask to verify ---
    N2, p = 256, 0.1
    z2 = jax.random.normal(kz2, (N2, D), dtype=jnp.float32)
    adj_train = inner_product_decoder(z2, dropout=p, training=True, key=kdrop)
    adj_train = jax.block_until_ready(adj_train)

    bits = jax.random.bits(kdrop, (N2, D), dtype=jnp.uint32)
    keep = (bits >> 8).astype(jnp.int32) >= jnp.int32(int(round(p * (1 << 24))))
    z2_drop = jnp.where(keep, z2 * jnp.float32(1.0 / (1.0 - p)), jnp.zeros_like(z2))
    ref_train = jax.nn.sigmoid(jnp.dot(z2_drop, z2_drop.T, precision="highest"))
    assert adj_train.shape == (N2, N2)
    assert float(jnp.max(jnp.abs(adj_train - ref_train))) < 2e-3

    print("KERNEL_OK")
</pallas_src>

<mosaic_0001>
module attributes {stable_mosaic.version = 11 : i64} {
  func.func @_inner_product_kernel(%arg0: i32, %arg1: i32, %arg2: memref<256x64xf32, #tpu.memory_space<vmem>>, %arg3: memref<512x64xf32, #tpu.memory_space<vmem>>, %arg4: memref<256x256xf32, #tpu.memory_space<vmem>>) attributes {dimension_semantics = [#tpu.dimension_semantics<parallel>, #tpu.dimension_semantics<parallel>], iteration_bounds = array<i64: 2, 2>, scalar_prefetch = 0 : i64, scratch_operands = 0 : i64, tpu.core_type = #tpu.core_type<tc>, window_params = [{transform_indices = @transform_0, window_bounds = array<i64: 256, 64>}, {pipeline_mode = #tpu.pipeline_mode<synchronous>, transform_indices = @transform_1, window_bounds = array<i64: 512, 64>}, {transform_indices = @transform_2, window_bounds = array<i64: 256, 256>}]} {
    %c0 = arith.constant 0 : index
    %c0_0 = arith.constant 0 : index
    %0 = vector.load %arg2[%c0, %c0_0] : memref<256x64xf32, #tpu.memory_space<vmem>>, vector<256x64xf32>
    %c256_i32 = arith.constant 256 : i32
    %1 = arith.muli %arg1, %c256_i32 : i32
    %2 = tpu.assume_multiple %1, 256 : i32
    %3 = arith.index_cast %2 : i32 to index
    %c0_1 = arith.constant 0 : index
    %4 = vector.load %arg3[%3, %c0_1] : memref<512x64xf32, #tpu.memory_space<vmem>>, vector<256x64xf32>
    %cst = arith.constant dense<0.000000e+00> : vector<256x256xf32>
    %5 = tpu.matmul %0, %4, %cst {dimension_numbers = #tpu.dot_dimension_numbers<[1], [1], [0], [0], [0, 0, 1, 0], [], []>} : vector<256x64xf32>, vector<256x64xf32>, vector<256x256xf32> -> vector<256x256xf32>
    %6 = arith.negf %5 : vector<256x256xf32>
    %7 = math.exp %6 : vector<256x256xf32>
    %cst_2 = arith.constant 1.000000e+00 : f32
    %8 = vector.broadcast %cst_2 : f32 to vector<256x256xf32>
    %9 = arith.addf %8, %7 : vector<256x256xf32>
    %10 = arith.divf %8, %9 : vector<256x256xf32>
    %c0_3 = arith.constant 0 : index
    %c0_4 = arith.constant 0 : index
    %11 = vector.load %arg4[%c0_3, %c0_4] : memref<256x256xf32, #tpu.memory_space<vmem>>, vector<256x256xf32>
    tpu.vector_store %arg4[%c0_3, %c0_4], %10 {strides = array<i32>} : memref<256x256xf32, #tpu.memory_space<vmem>>, vector<256x256xf32>,
    return
  }
  func.func @transform_0(%arg0: i32, %arg1: i32) -> (i32, i32) {
    %c0_i32 = arith.constant 0 : i32
    %c0_i32_0 = arith.constant 0 : i32
    return %arg0, %c0_i32 : i32, i32
  }
  func.func @transform_1(%arg0: i32, %arg1: i32) -> (i32, i32) {
    %c0_i32 = arith.constant 0 : i32
    %c0_i32_0 = arith.constant 0 : i32
    %c0_i32_1 = arith.constant 0 : i32
    return %c0_i32, %c0_i32_0 : i32, i32
  }
  func.func @transform_2(%arg0: i32, %arg1: i32) -> (i32, i32) {
    %c0_i32 = arith.constant 0 : i32
    return %arg0, %arg1 : i32, i32
  }
}

</mosaic_0001>

<bundles_post_ra>
// kernel: tpu_custom_call.1
= control target key start
LH: loop header
LB: loop body
LE: loop exit
PB: predicated region body
PF: predicated region fallthrough
CT: control target
= control target key end

     0   :  { %7 = vsyncpa [#allocation3], 0  ;;  %s2508_s0 = inlined_call_operand.vmem [shape: f32[512,64], index: 0, kind: input, shape index: {}]   ;;  %s2509_s1 = inlined_call_operand.vmem [shape: f32[512,64], index: 1, kind: input, shape index: {}]   ;;  %s2510_s2 = inlined_call_operand.hbm [shape: f32[512,512], index: 2, kind: output, shape index: {}]  }
   0x1   :  { %9 = vsyncpa [#allocation3 + $0x1], 0  ;;  %s1969_s9 = smov 0   ;;  %s1971_s10 = smov 0  }
   0x2   :  { %s1973_s11 = smov 0   ;;  %s1975_s12 = smov 0  }
   0x3   :  { %s1977_s13 = smov 0   ;;  %s1979_s14 = smov 0  }
   0x4   :  { %s1981_s15 = smov 0   ;;  %s1983_s16 = smov 0  }
   0x5 LB: > { %s1219_s17 = sadd.s32 4294967295, %s1948_s16   ;;  %s1220_s18 = sadd.s32 4294967294, %s1948_s16   ;;  %s1948_s16 = sphi %s1983_s16, %s15_s16   ;;  %s1944_s15 = sphi %s1981_s15, %s2521_s15   ;;  %s1940_s14 = sphi %s1979_s14, %s2520_s14   ;;  %s1936_s13 = sphi %s1977_s13, %s2519_s13   ;;  %s1932_s12 = sphi %s1975_s12, %s2518_s12   ;;  %s1928_s11 = sphi %s1973_s11, %s2517_s11   ;;  %s1924_s10 = sphi %s1971_s10, %s2516_s10   ;;  %s1920_s9 = sphi %s1969_s9, %s2515_s9  }
   0x6   : > { %s24_s19 = sadd.s32 1, %s1940_s14  ;;  %s27_s20 = sadd.s32 1, %s1944_s15 }
   0x7   : > { %p25_p0 = scmp.ge.s32.totalorder %s24_s19, 2  ;;  %p93_p1 = scmp.ne.s32.totalorder %s1928_s11, %s1924_s10 }
   0x8   : > { %p94_p2 = scmp.eq.s32.totalorder %s1219_s17, 3  ;;  %p99_p5 = scmp.ne.s32.totalorder %s1924_s10, %s1920_s9 }
   0x9   : > { %s2523_s19 = smov (%p25_p0, %s24_s19), 0  ;;  %s2525_s20 = smov (!%p25_p0, %s27_s20), %s1944_s15 }
   0xa   : > { %s79_s21 = ssub.s32 %s1940_s14, %s2523_s19  ;;  %p2020_p3 = por %p94_p2, %p93_p1 }
   0xb   : > { %p29_p4 = scmp.ge.s32.totalorder %s2525_s20, 2  ;;  %p100_p6 = scmp.eq.s32.totalorder %s1220_s18, 3 }
   0xc   : > { %p1223_p7 = scmp.ge.s32.totalorder %s1948_s16, 1  ;;  %p130_p9 = scmp.lt.s32.totalorder %s1948_s16, 5 }
   0xd   : > { %s2527_s20 = smov (%p29_p4, %s2525_s20), 0  ;;  %p2029_p8 = por %p100_p6, %p99_p5 }
   0xe   : > { %s78_s24 = ssub.s32 %s1944_s15, %s2527_s20  ;;  %s83_s25 = sadd.s32 1, %s1928_s11 }
   0xf   : > { %s80_s26 = sor.u32 %s79_s21, %s78_s24  ;;  %p131_p10 = pnand %p1223_p7, %p130_p9 }
  0x10   : > { %p81_p11 = scmp.eq.s32.totalorder %s80_s26, 0  ;;  %s1227_s28 = sshll.u32 (!%p131_p10), %s1932_s12, 8  ;;  %vm226_vm0 = vcmask (!%p131_p10), 523264  }
  0x11   : > { %134 = sbr.rel (%p131_p10) target bundleno = 457 (0x1c9), region = 28  ;;  %s1225_s29 = sshll.u32 (!%p131_p10), %s1936_s13, 5  ;;  %vm2049_vm1 = vmpackc.low (!%p131_p10), %vm226_vm0, %vm226_vm0 }
  0x12   : > { %s2038_s27 = scalar_select %p81_p11, %s1928_s11, %s83_s25  }
  0x13   : > { %s2045_s4 = scalar_lea.vmem (!%p131_p10), %s2509_s1, %s1227_s28  ;;  %p153_p12 = scmp.lt.s32.totalorder (!%p131_p10), %s1225_s29, 63 }
  0x14   : > { %v210_v1 = vld [vmem:[%s2045_s4 + $0x80] sm:$0xff] (!%p131_p10)  ;;  %v211_v2 = vld [vmem:[%s2045_s4 + $0x88] sm:$0xff] (!%p131_p10)  ;;  %v212_v6 = vld [vmem:[%s2045_s4 + $0x90] sm:$0xff] (!%p131_p10)  ;;  %s149_s17 = sand.u32 (!%p131_p10), 1, %s1924_s10   ;;  %s1358_s24 = sshll.u32 (!%p131_p10), %s1932_s12, 1 }
  0x15   : > { %v194_v3 = vld [vmem:[%s2045_s4] sm:$0xff] (!%p131_p10)  ;;  %v1460_v4 = vpack.c.bf16 (!%p131_p10), %v211_v2, %v210_v1  ;;  %v195_v5 = vld [vmem:[%s2045_s4 + $0x8] sm:$0xff] (!%p131_p10)  ;;  %v213_v7 = vld [vmem:[%s2045_s4 + $0x98] sm:$0xff] (!%p131_p10)  ;;  %s1224_s18 = sshll.u32 (!%p131_p10), %s149_s17, 9  ;;  %s1363_s25 = sshll.u32 (!%p131_p10), %s1936_s13, 7 }
  0x16   : > { %v1463_v8 = vpack.c.bf16 (!%p131_p10), %v195_v5, %v194_v3  ;;  %v1466_v9 = vpack.c.bf16 (!%p131_p10), %v213_v7, %v212_v6  ;;  %v196_v10 = vld [vmem:[%s2045_s4 + $0x10] sm:$0xff] (!%p131_p10)  ;;  %v197_v11 = vld [vmem:[%s2045_s4 + $0x18] sm:$0xff] (!%p131_p10)  ;;  %v214_v12 = vld [vmem:[%s2045_s4 + $0xa0] sm:$0xff] (!%p131_p10)  ;;  %s2267_s21 = scalar_lea.vmem (!%p131_p10), [#allocation2], %s1224_s18  ;;  %s1138_s26 = sadd.s32 (!%p131_p10), %s1363_s25, %s1358_s24 }
  0x17   : > { %1462 = vmatprep.subr.msk.bf16.mxu0 (!%p131_p10), %vm2049_vm1, %v1460_v4  ;;  %1508 = vmatprep.subr.msk.bf16.mxu1 (!%p131_p10), %vm2049_vm1, %v1460_v4  ;;  %v215_v13 = vld [vmem:[%s2045_s4 + $0xa8] sm:$0xff] (!%p131_p10)  ;;  %v1469_v14 = vpack.c.bf16 (!%p131_p10), %v197_v11, %v196_v10  ;;  %v198_v18 = vld [vmem:[%s2045_s4 + $0x20] sm:$0xff] (!%p131_p10)  ;;  %v216_v20 = vld [vmem:[%s2045_s4 + $0xb0] sm:$0xff] (!%p131_p10)  ;;  %s1360_s12 = sshll.u32 (!%p131_p10), %s1138_s26, 7  ;;  %s1141_s13 = sshll.u32 (!%p131_p10), %s2267_s21, 4  ;;  %s2449_s13 = int_to_ptr.vmem [resolvable:$true] %s1141_s13 }
  0x18   : > { %s2529_s29 = smov (!%p153_p12, %s1225_s29), 63  ;;  %1465 = vmatpush3.bf16.xpose.msk.msra.mxu0 %vm2049_vm1, %v1463_v8  ;;  %1516 = vmatpush3.bf16.xpose.msk.msra.mxu1 %vm2049_vm1, %v1463_v8  ;;  %v1472_v15 = vpack.c.bf16 %v215_v13, %v214_v12  ;;  %v199_v19 = vld [vmem:[%s2045_s4 + $0x28] sm:$0xff]  ;;  %v217_v21 = vld [vmem:[%s2045_s4 + $0xb8] sm:$0xff]  ;;  %v200_v24 = vld [vmem:[%s2045_s4 + $0x30] sm:$0xff]  ;;  %s2446_s30 = scalar_lea.hbm %s2510_s2, %s1360_s12 }
  0x19   : > { %s1226_s5 = sshll.u32 %s2529_s29, 3  ;;  %1468 = vmatprep.subr.msk.bf16.mxu0 %vm2049_vm1, %v1466_v9  ;;  %1509 = vmatprep.subr.msk.bf16.mxu1 %vm2049_vm1, %v1466_v9  ;;  %v1475_v22 = vpack.c.bf16 %v199_v19, %v198_v18  ;;  %v1478_v23 = vpack.c.bf16 %v217_v21, %v216_v20  ;;  %v201_v25 = vld [vmem:[%s2045_s4 + $0x38] sm:$0xff]  ;;  %v218_v26 = vld [vmem:[%s2045_s4 + $0xc0] sm:$0xff]  ;;  %v219_v27 = vld [vmem:[%s2045_s4 + $0xc8] sm:$0xff]  ;;  %s2456_s3 = scalar_lea.sflag [#allocation3], %s149_s17 }
  0x1a   : > { %s2078_s8 = scalar_lea.vmem %s2508_s0, %s1226_s5  ;;  %v1481_v28 = vpack.c.bf16 %v201_v25, %v200_v24  ;;  %v1484_v29 = vpack.c.bf16 %v219_v27, %v218_v26  ;;  %v202_v30 = vld [vmem:[%s2045_s4 + $0x40] sm:$0xff]  ;;  %v203_v31 = vld [vmem:[%s2045_s4 + $0x48] sm:$0xff]  ;;  %v220_v32 = vld [vmem:[%s2045_s4 + $0xd0] sm:$0xff]  ;;  %s1950_s5 = smov [#allocation2]  }
  0x1b   : > { %v2081_v16 = vld [vmem:[%s2078_s8] sm:$0xff]  ;;  %v221_v33 = vld [vmem:[%s2045_s4 + $0xd8] sm:$0xff]  ;;  %v1487_v34 = vpack.c.bf16 %v203_v31, %v202_v30  ;;  %v204_v36 = vld [vmem:[%s2045_s4 + $0x50] sm:$0xff]  ;;  %s1858_s6 = sshll.u32 %s1950_s5, 4  ;;  %s1859_s6 = int_to_ptr.vmem [resolvable:$false] %s1858_s6 }
  0x1c   : > { %1396 = vmatprep.mubr.msk.f32.mxu0 %vm226_vm0, %v2081_v16  ;;  %v2086_v17 = vld [vmem:[%s2078_s8 + $0x80] sm:$0xff]  ;;  %v1490_v35 = vpack.c.bf16 %v221_v33, %v220_v32  ;;  %v205_v37 = vld [vmem:[%s2045_s4 + $0x58] sm:$0xff]  ;;  %v223_v39 = vld [vmem:[%s2045_s4 + $0xe8] sm:$0xff]  ;;  %s1860_s7 = scalar_lea.vmem %s1859_s6, 16384  ;;  %p1861_p2 = scmp.lt.s32.totalorder %s2449_s13, %s1859_s6 }
  0x1d   : > { %1428 = vmatprep.mubr.msk.f32.mxu1 %vm226_vm0, %v2086_v17  ;;  %v222_v38 = vld [vmem:[%s2045_s4 + $0xe0] sm:$0xff]  ;;  %v1493_v40 = vpack.c.bf16 %v205_v37, %v204_v36  ;;  %v207_v43 = vld [vmem:[%s2045_s4 + $0x68] sm:$0xff]  ;;  %v224_v44 = vld [vmem:[%s2045_s4 + $0xf0] sm:$0xff] }
  0x1e   : > { %v1496_v41 = vpack.c.bf16 %v223_v39, %v222_v38  ;;  %v206_v42 = vld [vmem:[%s2045_s4 + $0x60] sm:$0xff]  ;;  %v225_v45 = vld [vmem:[%s2045_s4 + $0xf8] sm:$0xff]  ;;  %v208_v48 = vld [vmem:[%s2045_s4 + $0x70] sm:$0xff] }
  0x1f   : > { %v1499_v46 = vpack.c.bf16 %v207_v43, %v206_v42  ;;  %v1502_v47 = vpack.c.bf16 %v225_v45, %v224_v44  ;;  %v209_v49 = vld [vmem:[%s2045_s4 + $0x78] sm:$0xff]  ;;  %v161_v51 = vld [vmem:[%s2078_s8 + $0x8] sm:$0xff]  ;;  %v162_v53 = vld [vmem:[%s2078_s8 + $0x10] sm:$0xff]  ;;  %s1854_s4 = scalar_lea.vmem %s2449_s13, 8192 }
  0x20   : > { %1471 = vmatpush3.bf16.xpose.msk.msra.mxu0 %vm2049_vm1, %v1469_v14  ;;  %1517 = vmatpush3.bf16.xpose.msk.msra.mxu1 %vm2049_vm1, %v1469_v14  ;;  %v1505_v50 = vpack.c.bf16 %v209_v49, %v208_v48  ;;  %v177_v52 = vld [vmem:[%s2078_s8 + $0x88] sm:$0xff]  ;;  %v178_v54 = vld [vmem:[%s2078_s8 + $0x90] sm:$0xff]  ;;  %v163_v55 = vld [vmem:[%s2078_s8 + $0x18] sm:$0xff]  ;;  %p1855_p13 = scmp.ne.s32.totalorder %s2449_s13, %s1854_s4  ;;  %p1862_p4 = scmp.lt.s32.totalorder %s1860_s7, %s1854_s4 }
  0x21   : > { %1474 = vmatprep.subr.msk.bf16.mxu0 %vm2049_vm1, %v1472_v15  ;;  %1510 = vmatprep.subr.msk.bf16.mxu1 %vm2049_vm1, %v1472_v15  ;;  %v179_v56 = vld [vmem:[%s2078_s8 + $0x98] sm:$0xff]  ;;  %v164_v57 = vld [vmem:[%s2078_s8 + $0x20] sm:$0xff]  ;;  %v165_v59 = vld [vmem:[%s2078_s8 + $0x28] sm:$0xff] }
  0x22   : > { %v180_v58 = vld [vmem:[%s2078_s8 + $0xa0] sm:$0xff]  ;;  %v181_v60 = vld [vmem:[%s2078_s8 + $0xa8] sm:$0xff]  ;;  %v166_v61 = vld [vmem:[%s2078_s8 + $0x30] sm:$0xff]  ;;  %p1856_p0 = pnand %p1855_p13, %p2020_p3  ;;  %p1863_p5 = por %p1862_p4, %p1861_p2 }
  0x23   : > { %v182_v62 = vld [vmem:[%s2078_s8 + $0xb0] sm:$0xff]  ;;  %v167_v63 = vld [vmem:[%s2078_s8 + $0x38] sm:$0xff]  ;;  %v168_v1 = vld [vmem:[%s2078_s8 + $0x40] sm:$0xff] }
  0x24   : > { %v183_v0 = vld [vmem:[%s2078_s8 + $0xb8] sm:$0xff]  ;;  %v184_v2 = vld [vmem:[%s2078_s8 + $0xc0] sm:$0xff]  ;;  %v169_v3 = vld [vmem:[%s2078_s8 + $0x48] sm:$0xff]  ;;  %p1857_p1 = pneg %p1856_p0 }
  0x25   : > { %v185_v4 = vld [vmem:[%s2078_s8 + $0xc8] sm:$0xff]  ;;  %v170_v5 = vld [vmem:[%s2078_s8 + $0x50] sm:$0xff]  ;;  %v171_v7 = vld [vmem:[%s2078_s8 + $0x58] sm:$0xff] }
  0x26   : > { %v186_v6 = vld [vmem:[%s2078_s8 + $0xd0] sm:$0xff]  ;;  %v187_v8 = vld [vmem:[%s2078_s8 + $0xd8] sm:$0xff]  ;;  %v172_v9 = vld [vmem:[%s2078_s8 + $0x60] sm:$0xff]  ;;  %p1864_p6 = pnand %p1863_p5, %p1857_p1 }
  0x27   : > { %v188_v10 = vld [vmem:[%s2078_s8 + $0xe0] sm:$0xff]  ;;  %v173_v11 = vld [vmem:[%s2078_s8 + $0x68] sm:$0xff]  ;;  %v174_v13 = vld [vmem:[%s2078_s8 + $0x70] sm:$0xff] }
  0x28   : > { %1477 = vmatpush3.bf16.xpose.msk.msra.mxu0 %vm2049_vm1, %v1475_v22  ;;  %1518 = vmatpush3.bf16.xpose.msk.msra.mxu1 %vm2049_vm1, %v1475_v22  ;;  %v189_v12 = vld [vmem:[%s2078_s8 + $0xe8] sm:$0xff]  ;;  %v190_v14 = vld [vmem:[%s2078_s8 + $0xf0] sm:$0xff]  ;;  %v175_v15 = vld [vmem:[%s2078_s8 + $0x78] sm:$0xff] }
  0x29   : > { %1480 = vmatprep.subr.msk.bf16.mxu0 %vm2049_vm1, %v1478_v23  ;;  %1511 = vmatprep.subr.msk.bf16.mxu1 %vm2049_vm1, %v1478_v23 }
  0x30   : > { %1483 = vmatpush3.bf16.xpose.msk.msra.mxu0 %vm2049_vm1, %v1481_v28  ;;  %1519 = vmatpush3.bf16.xpose.msk.msra.mxu1 %vm2049_vm1, %v1481_v28 }
  0x31   : > { %1486 = vmatprep.subr.msk.bf16.mxu0 %vm2049_vm1, %v1484_v29  ;;  %1512 = vmatprep.subr.msk.bf16.mxu1 %vm2049_vm1, %v1484_v29 }
  0x38   : > { %1489 = vmatpush3.bf16.xpose.msk.msra.mxu0 %vm2049_vm1, %v1487_v34  ;;  %1520 = vmatpush3.bf16.xpose.msk.msra.mxu1 %vm2049_vm1, %v1487_v34 }
  0x39   : > { %1492 = vmatprep.subr.msk.bf16.mxu0 %vm2049_vm1, %v1490_v35  ;;  %1513 = vmatprep.subr.msk.bf16.mxu1 %vm2049_vm1, %v1490_v35 }
  0x40   : > { %1495 = vmatpush3.bf16.xpose.msk.msra.mxu0 %vm2049_vm1, %v1493_v40  ;;  %1521 = vmatpush3.bf16.xpose.msk.msra.mxu1 %vm2049_vm1, %v1493_v40 }
  0x41   : > { %1498 = vmatprep.subr.msk.bf16.mxu0 %vm2049_vm1, %v1496_v41  ;;  %1514 = vmatprep.subr.msk.bf16.mxu1 %vm2049_vm1, %v1496_v41 }
  0x48   : > { %1501 = vmatpush3.bf16.xpose.msk.msra.mxu0 %vm2049_vm1, %v1499_v46  ;;  %1522 = vmatpush3.bf16.xpose.msk.msra.mxu1 %vm2049_vm1, %v1499_v46 }
  0x49   : > { %1504 = vmatprep.subr.msk.bf16.mxu0 %vm2049_vm1, %v1502_v47  ;;  %1515 = vmatprep.subr.msk.bf16.mxu1 %vm2049_vm1, %v1502_v47 }
  0x50   : > { %1507 = vmatpush3.bf16.xpose.msk.msra.mxu0 %vm2049_vm1, %v1505_v50  ;;  %1523 = vmatpush3.bf16.xpose.msk.msra.mxu1 %vm2049_vm1, %v1505_v50 }
  0x57   : > { %1397 = vmatmul.mubr.msk.f32.vlgmr.msra.gmra.mrb[0].mxu0 %vm226_vm0, %v2081_v16  ;;  %1429 = vmatmul.mubr.msk.f32.vlgmr.msra.gmra.mrb[0].mxu1 %vm226_vm0, %v2086_v17  ;;  %v191_v16 = vld [vmem:[%s2078_s8 + $0xf8] sm:$0xff] }
  0x58   : > { %1398 = vmatprep.mubr.msk.f32.mxu0 %vm226_vm0, %v161_v51  ;;  %1430 = vmatprep.mubr.msk.f32.mxu1 %vm226_vm0, %v177_v52 }
  0x5b   : > { %1399 = vmatmul.mubr.msk.f32.gmra.mrb[2].mxu0 %vm226_vm0, %v161_v51  ;;  %1431 = vmatmul.mubr.msk.f32.gmra.mrb[2].mxu1 %vm226_vm0, %v177_v52 }
  0x5c   : > { %1400 = vmatprep.mubr.msk.f32.mxu0 %vm226_vm0, %v162_v53  ;;  %1432 = vmatprep.mubr.msk.f32.mxu1 %vm226_vm0, %v178_v54 }
  0x5f   : > { %1401 = vmatmul.mubr.msk.f32.gmra.mrb[4].mxu0 %vm226_vm0, %v162_v53  ;;  %1433 = vmatmul.mubr.msk.f32.gmra.mrb[4].mxu1 %vm226_vm0, %v178_v54 }
  0x60   : > { %1402 = vmatprep.mubr.msk.f32.mxu0 %vm226_vm0, %v163_v55  ;;  %1434 = vmatprep.mubr.msk.f32.mxu1 %vm226_vm0, %v179_v56 }
  0x63   : > { %1403 = vmatmul.mubr.msk.f32.gmra.mrb[6].mxu0 %vm226_vm0, %v163_v55  ;;  %1435 = vmatmul.mubr.msk.f32.gmra.mrb[6].mxu1 %vm226_vm0, %v179_v56 }
  0x64   : > { %1404 = vmatprep.mubr.msk.f32.mxu0 %vm226_vm0, %v164_v57  ;;  %1436 = vmatprep.mubr.msk.f32.mxu1 %vm226_vm0, %v180_v58 }
  0x67   : > { %1405 = vmatmul.mubr.msk.f32.gmra.mrb[8].mxu0 %vm226_vm0, %v164_v57  ;;  %1437 = vmatmul.mubr.msk.f32.gmra.mrb[8].mxu1 %vm226_vm0, %v180_v58 }
  0x68   : > { %1406 = vmatprep.mubr.msk.f32.mxu0 %vm226_vm0, %v165_v59  ;;  %1438 = vmatprep.mubr.msk.f32.mxu1 %vm226_vm0, %v181_v60 }
  0x6b   : > { %1407 = vmatmul.mubr.msk.f32.gmra.mrb[10].mxu0 %vm226_vm0, %v165_v59  ;;  %1439 = vmatmul.mubr.msk.f32.gmra.mrb[10].mxu1 %vm226_vm0, %v181_v60 }
  0x6c   : > { %1408 = vmatprep.mubr.msk.f32.mxu0 %vm226_vm0, %v166_v61  ;;  %1440 = vmatprep.mubr.msk.f32.mxu1 %vm226_vm0, %v182_v62 }
  0x6f   : > { %1409 = vmatmul.mubr.msk.f32.gmra.mrb[12].mxu0 %vm226_vm0, %v166_v61  ;;  %1441 = vmatmul.mubr.msk.f32.gmra.mrb[12].mxu1 %vm226_vm0, %v182_v62 }
  0x70   : > { %1410 = vmatprep.mubr.msk.f32.mxu0 %vm226_vm0, %v167_v63  ;;  %1442 = vmatprep.mubr.msk.f32.mxu1 %vm226_vm0, %v183_v0 }
  0x73   : > { %1411 = vmatmul.mubr.msk.f32.gmra.mrb[14].mxu0 %vm226_vm0, %v167_v63  ;;  %1443 = vmatmul.mubr.msk.f32.gmra.mrb[14].mxu1 %vm226_vm0, %v183_v0 }
  0x74   : > { %1412 = vmatprep.mubr.msk.f32.mxu0 %vm226_vm0, %v168_v1  ;;  %1444 = vmatprep.mubr.msk.f32.mxu1 %vm226_vm0, %v184_v2 }
  0x77   : > { %1413 = vmatmul.mubr.msk.f32.gmra.mrb[16].mxu0 %vm226_vm0, %v168_v1  ;;  %1445 = vmatmul.mubr.msk.f32.gmra.mrb[16].mxu1 %vm226_vm0, %v184_v2 }
  0x78   : > { %1414 = vmatprep.mubr.msk.f32.mxu0 %vm226_vm0, %v169_v3  ;;  %1446 = vmatprep.mubr.msk.f32.mxu1 %vm226_vm0, %v185_v4 }
  0x7b   : > { %1415 = vmatmul.mubr.msk.f32.gmra.mrb[18].mxu0 %vm226_vm0, %v169_v3  ;;  %1447 = vmatmul.mubr.msk.f32.gmra.mrb[18].mxu1 %vm226_vm0, %v185_v4 }
  0x7c   : > { %1416 = vmatprep.mubr.msk.f32.mxu0 %vm226_vm0, %v170_v5  ;;  %1448 = vmatprep.mubr.msk.f32.mxu1 %vm226_vm0, %v186_v6 }
  0x7f   : > { %1417 = vmatmul.mubr.msk.f32.gmra.mrb[20].mxu0 %vm226_vm0, %v170_v5  ;;  %1449 = vmatmul.mubr.msk.f32.gmra.mrb[20].mxu1 %vm226_vm0, %v186_v6 }
  0x80   : > { %1418 = vmatprep.mubr.msk.f32.mxu0 %vm226_vm0, %v171_v7  ;;  %1450 = vmatprep.mubr.msk.f32.mxu1 %vm226_vm0, %v187_v8 }
  0x83   : > { %1419 = vmatmul.mubr.msk.f32.gmra.mrb[22].mxu0 %vm226_vm0, %v171_v7  ;;  %1451 = vmatmul.mubr.msk.f32.gmra.mrb[22].mxu1 %vm226_vm0, %v187_v8 }
  0x84   : > { %1420 = vmatprep.mubr.msk.f32.mxu0 %vm226_vm0, %v172_v9  ;;  %1452 = vmatprep.mubr.msk.f32.mxu1 %vm226_vm0, %v188_v10 }
  0x87   : > { %1421 = vmatmul.mubr.msk.f32.gmra.mrb[24].mxu0 %vm226_vm0, %v172_v9  ;;  %1453 = vmatmul.mubr.msk.f32.gmra.mrb[24].mxu1 %vm226_vm0, %v188_v10 }
  0x88   : > { %1422 = vmatprep.mubr.msk.f32.mxu0 %vm226_vm0, %v173_v11  ;;  %1454 = vmatprep.mubr.msk.f32.mxu1 %vm226_vm0, %v189_v12 }
  0x8b   : > { %1423 = vmatmul.mubr.msk.f32.gmra.mrb[26].mxu0 %vm226_vm0, %v173_v11  ;;  %1455 = vmatmul.mubr.msk.f32.gmra.mrb[26].mxu1 %vm226_vm0, %v189_v12 }
  0x8c   : > { %1424 = vmatprep.mubr.msk.f32.mxu0 %vm226_vm0, %v174_v13  ;;  %1456 = vmatprep.mubr.msk.f32.mxu1 %vm226_vm0, %v190_v14 }
  0x8f   : > { %1425 = vmatmul.mubr.msk.f32.gmra.mrb[28].mxu0 %vm226_vm0, %v174_v13  ;;  %1457 = vmatmul.mubr.msk.f32.gmra.mrb[28].mxu1 %vm226_vm0, %v190_v14 }
  0x90   : > { %1426 = vmatprep.mubr.msk.f32.mxu0 %vm226_vm0, %v175_v15  ;;  %1458 = vmatprep.mubr.msk.f32.mxu1 %vm226_vm0, %v191_v16 }
  0x93   : > { %1427 = vmatmul.mubr.msk.f32.gmra.mrb[30].mxu0 %vm226_vm0, %v175_v15  ;;  %1459 = vmatmul.mubr.msk.f32.gmra.mrb[30].mxu1 %vm226_vm0, %v191_v16 }
 0x12a   : > { %v485_v17 = vpop.f32.mrb[0].mxu0  ;;  %v581_v18 = vpop.f32.mrb[0].mxu1 }
 0x12b   : > { %v1292_v19 = vmul.f32 -1.442695, %v485_v17  ;;  %v1324_v20 = vmul.f32 -1.442695, %v581_v18  ;;  %v487_v21 = vpop.f32.mrb[1].mxu0  ;;  %v583_v22 = vpop.f32.mrb[1].mxu1 }
 0x12c   : > { %v1293_v23 = vmul.f32 -1.442695, %v487_v21  ;;  %v1325_v24 = vmul.f32 -1.442695, %v583_v22 }
 0x12d   : > { %1598 = vpow2.f32 %v1292_v19 }
 0x12e   : > { %1600 = vpow2.f32 %v1324_v20  ;;  %v491_v25 = vpop.f32.mrb[2].mxu0  ;;  %v587_v26 = vpop.f32.mrb[2].mxu1 }
 0x12f   : > { %1602 = vpow2.f32 %v1293_v23  ;;  %v1294_v27 = vmul.f32 -1.442695, %v491_v25  ;;  %v1326_v28 = vmul.f32 -1.442695, %v587_v26  ;;  %v493_v29 = vpop.f32.mrb[3].mxu0  ;;  %v589_v30 = vpop.f32.mrb[3].mxu1 }
 0x130   : > { %1604 = vpow2.f32 %v1325_v24  ;;  %v1295_v31 = vmul.f32 -1.442695, %v493_v29  ;;  %v1327_v32 = vmul.f32 -1.442695, %v589_v30 }
 0x131   : > { %1606 = vpow2.f32 %v1294_v27 }
 0x132   : > { %1608 = vpow2.f32 %v1326_v28  ;;  %v497_v33 = vpop.f32.mrb[4].mxu0  ;;  %v593_v34 = vpop.f32.mrb[4].mxu1 }
 0x133   : > { %1610 = vpow2.f32 %v1295_v31  ;;  %v1296_v35 = vmul.f32 -1.442695, %v497_v33  ;;  %v1328_v36 = vmul.f32 -1.442695, %v593_v34  ;;  %v499_v37 = vpop.f32.mrb[5].mxu0  ;;  %v595_v38 = vpop.f32.mrb[5].mxu1 }
 0x134   : > { %1612 = vpow2.f32 %v1327_v32  ;;  %v1297_v39 = vmul.f32 -1.442695, %v499_v37  ;;  %v1329_v40 = vmul.f32 -1.442695, %v595_v38 }
 0x135   : > { %1614 = vpow2.f32 %v1296_v35 }
 0x136   : > { %1616 = vpow2.f32 %v1328_v36  ;;  %v503_v41 = vpop.f32.mrb[6].mxu0  ;;  %v599_v42 = vpop.f32.mrb[6].mxu1 }
 0x137   : > { %v1599_v43 = vpop.eup %1598  ;;  %1618 = vpow2.f32 %v1297_v39  ;;  %v1298_v44 = vmul.f32 -1.442695, %v503_v41  ;;  %v505_v45 = vpop.f32.mrb[7].mxu0  ;;  %v1330_v17 = vmul.f32 -1.442695, %v599_v42 }
 0x138   : > { %v601_v46 = vpop.f32.mrb[7].mxu1  ;;  %v1601_v47 = vpop.eup %1600  ;;  %v868_v48 = vadd.f32 1.0, %v1599_v43  ;;  %1620 = vpow2.f32 %v1329_v40  ;;  %v1299_v21 = vmul.f32 -1.442695, %v505_v45 }
 0x139   : > { %v1603_v49 = vpop.eup %1602  ;;  %v900_v50 = vadd.f32 1.0, %v1601_v47  ;;  %1622 = vpow2.f32 %v1298_v44  ;;  %v1331_v24 = vmul.f32 -1.442695, %v601_v46 }
 0x13a   : > { %v1605_v51 = vpop.eup %1604  ;;  %1624 = vrcp.f32 %v868_v48  ;;  %v869_v52 = vadd.f32 1.0, %v1603_v49  ;;  %v509_v53 = vpop.f32.mrb[8].mxu0 }
 0x13b   : > { %v605_v54 = vpop.f32.mrb[8].mxu1  ;;  %v1607_v55 = vpop.eup %1606  ;;  %1626 = vrcp.f32 %v900_v50  ;;  %v901_v56 = vadd.f32 1.0, %v1605_v51  ;;  %v1300_v26 = vmul.f32 -1.442695, %v509_v53 }
 0x13c   : > { %v511_v57 = vpop.f32.mrb[9].mxu0  ;;  %v1609_v58 = vpop.eup %1608  ;;  %1628 = vrcp.f32 %v869_v52  ;;  %v870_v59 = vadd.f32 1.0, %v1607_v55  ;;  %v1332_v30 = vmul.f32 -1.442695, %v605_v54 }
 0x13d   : > { %v607_v60 = vpop.f32.mrb[9].mxu1  ;;  %v1611_v61 = vpop.eup %1610  ;;  %1630 = vrcp.f32 %v901_v56  ;;  %v902_v62 = vadd.f32 1.0, %v1609_v58  ;;  %v1301_v34 = vmul.f32 -1.442695, %v511_v57 }
 0x13e   : > { %v1613_v63 = vpop.eup %1612  ;;  %1632 = vrcp.f32 %v870_v59  ;;  %v871_v0 = vadd.f32 1.0, %v1611_v61  ;;  %v515_v1 = vpop.f32.mrb[10].mxu0  ;;  %v1333_v36 = vmul.f32 -1.442695, %v607_v60 }
 0x13f   : > { %v611_v2 = vpop.f32.mrb[10].mxu1  ;;  %v1615_v3 = vpop.eup %1614  ;;  %1634 = vrcp.f32 %v902_v62  ;;  %v903_v4 = vadd.f32 1.0, %v1613_v63  ;;  %v1302_v38 = vmul.f32 -1.442695, %v515_v1 }
 0x140   : > { %v517_v5 = vpop.f32.mrb[11].mxu0  ;;  %v1617_v6 = vpop.eup %1616  ;;  %1636 = vrcp.f32 %v871_v0  ;;  %v872_v7 = vadd.f32 1.0, %v1615_v3  ;;  %v1334_v42 = vmul.f32 -1.442695, %v611_v2 }
 0x141   : > { %v613_v8 = vpop.f32.mrb[11].mxu1  ;;  %v1619_v9 = vpop.eup %1618  ;;  %1638 = vrcp.f32 %v903_v4  ;;  %v904_v10 = vadd.f32 1.0, %v1617_v6  ;;  %v1303_v46 = vmul.f32 -1.442695, %v517_v5 }
 0x142   : > { %v1621_v11 = vpop.eup %1620  ;;  %1640 = vrcp.f32 %v872_v7  ;;  %v873_v12 = vadd.f32 1.0, %v1619_v9  ;;  %v521_v13 = vpop.f32.mrb[12].mxu0  ;;  %v1335_v48 = vmul.f32 -1.442695, %v613_v8 }
 0x143   : > { %v2261_v14 = vpop.f32.mrb[12].mxu1  ;;  %v1623_v15 = vpop.eup %1622  ;;  %1642 = vrcp.f32 %v904_v10  ;;  %v905_v16 = vadd.f32 1.0, %v1621_v11  ;;  %v1304_v50 = vmul.f32 -1.442695, %v521_v13 }
 0x144   : > { %v2263_v18 = vpop.f32.mrb[13].mxu0  ;;  %v1625_v19 = vpop.eup %1624  ;;  %1644 = vrcp.f32 %v873_v12  ;;  %v874_v20 = vadd.f32 1.0, %v1623_v15  ;;  %v1336_v54 = vmul.f32 -1.442695, %v2261_v14 }
 0x145   : > { %v2265_v22 = vpop.f32.mrb[13].mxu1  ;;  %v1627_v23 = vpop.eup %1626  ;;  %1060 = vst [vmem:[%s2267_s21] sm:$0xff] %v1625_v19  ;;  %1646 = vrcp.f32 %v905_v16 }
 0x146   : > { %v1629_v25 = vpop.eup %1628  ;;  %1092 = vst [vmem:[%s2267_s21 + $0x100] sm:$0xff] %v1627_v23  ;;  %1648 = vrcp.f32 %v874_v20  ;;  %v2271_v27 = vpop.f32.mrb[14].mxu0 }
 0x147   : > { %v2273_v28 = vpop.f32.mrb[14].mxu1  ;;  %v1631_v29 = vpop.eup %1630  ;;  %1061 = vst [vmem:[%s2267_s21 + $0x8] sm:$0xff] %v1629_v25  ;;  %1650 = vpow2.f32 %v1330_v17 }
 0x148   : > { %v2276_v31 = vpop.f32.mrb[15].mxu0  ;;  %v2278_v32 = vpop.f32.mrb[15].mxu1  ;;  %1093 = vst [vmem:[%s2267_s21 + $0x108] sm:$0xff] %v1631_v29  ;;  %1652 = vpow2.f32 %v1299_v21 }
 0x149   : > { %v1633_v33 = vpop.eup %1632  ;;  %1654 = vpow2.f32 %v1331_v24 }
 0x14a   : > { %v1635_v35 = vpop.eup %1634  ;;  %1062 = vst [vmem:[%s2267_s21 + $0x10] sm:$0xff] %v1633_v33  ;;  %1656 = vpow2.f32 %v1300_v26  ;;  %v2283_v39 = vpop.f32.mrb[16].mxu0 }
 0x14b   : > { %v1637_v37 = vpop.eup %1636  ;;  %1094 = vst [vmem:[%s2267_s21 + $0x110] sm:$0xff] %v1635_v35  ;;  %v2285_v40 = vpop.f32.mrb[16].mxu1  ;;  %1658 = vpow2.f32 %v1332_v30 }
 0x14c   : > { %v1639_v41 = vpop.eup %1638  ;;  %1063 = vst [vmem:[%s2267_s21 + $0x18] sm:$0xff] %v1637_v37  ;;  %v2288_v43 = vpop.f32.mrb[17].mxu0  ;;  %1660 = vpow2.f32 %v1301_v34  ;;  %v1305_v37 = vmul.f32 -1.442695, %v2263_v18 }
 0x14d   : > { %v2290_v44 = vpop.f32.mrb[17].mxu1  ;;  %v1641_v45 = vpop.eup %1640  ;;  %1095 = vst [vmem:[%s2267_s21 + $0x118] sm:$0xff] %v1639_v41  ;;  %1662 = vpow2.f32 %v1333_v36 }
 0x14e   : > { %v1643_v47 = vpop.eup %1642  ;;  %1064 = vst [vmem:[%s2267_s21 + $0x20] sm:$0xff] %v1641_v45  ;;  %1664 = vpow2.f32 %v1302_v38  ;;  %v2295_v51 = vpop.f32.mrb[18].mxu0 }
 0x14f   : > { %v1645_v49 = vpop.eup %1644  ;;  %1096 = vst [vmem:[%s2267_s21 + $0x120] sm:$0xff] %v1643_v47  ;;  %v2297_v52 = vpop.f32.mrb[18].mxu1  ;;  %1666 = vpow2.f32 %v1334_v42  ;;  %v1337_v42 = vmul.f32 -1.442695, %v2265_v22  ;;  %v1338_v22 = vmul.f32 -1.442695, %v2273_v28 }
 0x150   : > { %v1647_v53 = vpop.eup %1646  ;;  %1065 = vst [vmem:[%s2267_s21 + $0x28] sm:$0xff] %v1645_v49  ;;  %v2301_v55 = vpop.f32.mrb[19].mxu0  ;;  %1668 = vpow2.f32 %v1303_v46  ;;  %v1308_v28 = vmul.f32 -1.442695, %v2283_v39  ;;  %v1341_v39 = vmul.f32 -1.442695, %v2290_v44 }
 0x151   : > { %v2303_v56 = vpop.f32.mrb[19].mxu1  ;;  %v1649_v57 = vpop.eup %1648  ;;  %1097 = vst [vmem:[%s2267_s21 + $0x128] sm:$0xff] %v1647_v53  ;;  %1670 = vpow2.f32 %v1335_v48  ;;  %v1306_v48 = vmul.f32 -1.442695, %v2271_v27  ;;  %v1339_v27 = vmul.f32 -1.442695, %v2278_v32 }
 0x152   : > { %v1651_v58 = vpop.eup %1650  ;;  %1066 = vst [vmem:[%s2267_s21 + $0x30] sm:$0xff] %v1649_v57  ;;  %1672 = vpow2.f32 %v1304_v50  ;;  %v2307_v61 = vpop.f32.mrb[20].mxu0  ;;  %v1340_v32 = vmul.f32 -1.442695, %v2285_v40  ;;  %v1310_v40 = vmul.f32 -1.442695, %v2295_v51 }
 0x153   : > { %v1653_v59 = vpop.eup %1652  ;;  %v906_v60 = vadd.f32 1.0, %v1651_v58  ;;  %v2309_v62 = vpop.f32.mrb[20].mxu1  ;;  %1674 = vpow2.f32 %v1336_v54  ;;  %v1307_v54 = vmul.f32 -1.442695, %v2276_v31  ;;  %v1342_v44 = vmul.f32 -1.442695, %v2297_v52 }
 0x154   : > { %v1655_v63 = vpop.eup %1654  ;;  %v875_v0 = vadd.f32 1.0, %v1653_v59  ;;  %v2311_v1 = vpop.f32.mrb[21].mxu0 }
 0x155   : > { %v1657_v2 = vpop.eup %1656  ;;  %1676 = vrcp.f32 %v906_v60  ;;  %v907_v3 = vadd.f32 1.0, %v1655_v63  ;;  %v2313_v4 = vpop.f32.mrb[21].mxu1 }
 0x156   : > { %v1659_v5 = vpop.eup %1658  ;;  %1678 = vrcp.f32 %v875_v0  ;;  %v876_v6 = vadd.f32 1.0, %v1657_v2  ;;  %v2315_v9 = vpop.f32.mrb[22].mxu0 }
 0x157   : > { %v1661_v7 = vpop.eup %1660  ;;  %1680 = vrcp.f32 %v907_v3  ;;  %v908_v8 = vadd.f32 1.0, %v1659_v5  ;;  %v2317_v10 = vpop.f32.mrb[22].mxu1  ;;  %v1309_v3 = vmul.f32 -1.442695, %v2288_v43 }
 0x158   : > { %v1663_v11 = vpop.eup %1662  ;;  %1682 = vrcp.f32 %v876_v6  ;;  %v877_v12 = vadd.f32 1.0, %v1661_v7  ;;  %v2319_v13 = vpop.f32.mrb[23].mxu0 }
 0x159   : > { %v1665_v14 = vpop.eup %1664  ;;  %1684 = vrcp.f32 %v908_v8  ;;  %v909_v15 = vadd.f32 1.0, %v1663_v11  ;;  %v2321_v16 = vpop.f32.mrb[23].mxu1 }
 0x15a   : > { %v1667_v17 = vpop.eup %1666  ;;  %1686 = vrcp.f32 %v877_v12  ;;  %v878_v19 = vadd.f32 1.0, %v1665_v14  ;;  %v2323_v23 = vpop.f32.mrb[24].mxu0 }
 0x15b   : > { %v1669_v20 = vpop.eup %1668  ;;  %1688 = vrcp.f32 %v909_v15  ;;  %v910_v21 = vadd.f32 1.0, %v1667_v17  ;;  %v2325_v24 = vpop.f32.mrb[24].mxu1  ;;  %v1311_v15 = vmul.f32 -1.442695, %v2301_v55 }
 0x15c   : > { %v1671_v25 = vpop.eup %1670  ;;  %1690 = vrcp.f32 %v878_v19  ;;  %v879_v26 = vadd.f32 1.0, %v1669_v20  ;;  %v2327_v29 = vpop.f32.mrb[25].mxu0 }
 0x15d   : > { %v1673_v30 = vpop.eup %1672  ;;  %1692 = vrcp.f32 %v910_v21  ;;  %v911_v33 = vadd.f32 1.0, %v1671_v25  ;;  %v2329_v34 = vpop.f32.mrb[25].mxu1 }
 0x15e   : > { %v1675_v35 = vpop.eup %1674  ;;  %1694 = vrcp.f32 %v879_v26  ;;  %v880_v36 = vadd.f32 1.0, %v1673_v30  ;;  %v2333_v45 = vpop.f32.mrb[26].mxu0 }
 0x15f   : > { %v1677_v38 = vpop.eup %1676  ;;  %1696 = vrcp.f32 %v911_v33  ;;  %v912_v41 = vadd.f32 1.0, %v1675_v35  ;;  %v2335_v46 = vpop.f32.mrb[26].mxu1 }
 0x160   : > { %v1679_v47 = vpop.eup %1678  ;;  %1098 = vst [vmem:[%s2267_s21 + $0x130] sm:$0xff] %v1677_v38  ;;  %1698 = vrcp.f32 %v880_v36  ;;  %v2339_v49 = vpop.f32.mrb[27].mxu0 }
 0x161   : > { %v2341_v50 = vpop.f32.mrb[27].mxu1  ;;  %v1681_v18 = vpop.eup %1680  ;;  %1067 = vst [vmem:[%s2267_s21 + $0x38] sm:$0xff] %v1679_v47  ;;  %1700 = vrcp.f32 %v912_v41 }
 0x162   : > { %v1683_v53 = vpop.eup %1682  ;;  %1099 = vst [vmem:[%s2267_s21 + $0x138] sm:$0xff] %v1681_v18  ;;  %1702 = vpow2.f32 %v1305_v37  ;;  %v2349_v58 = vpop.f32.mrb[28].mxu0 }
 0x163   : > { %v1685_v57 = vpop.eup %1684  ;;  %1068 = vst [vmem:[%s2267_s21 + $0x40] sm:$0xff] %v1683_v53  ;;  %1704 = vpow2.f32 %v1337_v42  ;;  %v2351_v59 = vpop.f32.mrb[28].mxu1 }
 0x164   : > { %v1687_v60 = vpop.eup %1686  ;;  %1100 = vst [vmem:[%s2267_s21 + $0x140] sm:$0xff] %v1685_v57  ;;  %1706 = vpow2.f32 %v1306_v48  ;;  %v2355_v63 = vpop.f32.mrb[29].mxu0 }
 0x165   : > { %v2357_v0 = vpop.f32.mrb[29].mxu1  ;;  %v1689_v31 = vpop.eup %1688  ;;  %1069 = vst [vmem:[%s2267_s21 + $0x48] sm:$0xff] %v1687_v60  ;;  %1708 = vpow2.f32 %v1338_v22 }
 0x166   : > { %v1691_v2 = vpop.eup %1690  ;;  %1101 = vst [vmem:[%s2267_s21 + $0x148] sm:$0xff] %v1689_v31  ;;  %1710 = vpow2.f32 %v1307_v54  ;;  %v2365_v6 = vpop.f32.mrb[30].mxu0 }
 0x167   : > { %v1693_v5 = vpop.eup %1692  ;;  %1070 = vst [vmem:[%s2267_s21 + $0x50] sm:$0xff] %v1691_v2  ;;  %1712 = vpow2.f32 %v1339_v27  ;;  %v2367_v7 = vpop.f32.mrb[30].mxu1  ;;  %v1312_v2 = vmul.f32 -1.442695, %v2307_v61  ;;  %v1314_v61 = vmul.f32 -1.442695, %v2315_v9 }
 0x168   : > { %v1695_v8 = vpop.eup %1694  ;;  %1102 = vst [vmem:[%s2267_s21 + $0x150] sm:$0xff] %v1693_v5  ;;  %1714 = vpow2.f32 %v1308_v28  ;;  %v2371_v11 = vpop.f32.mrb[31].mxu0  ;;  %v1343_v28 = vmul.f32 -1.442695, %v2303_v56  ;;  %v1344_v5 = vmul.f32 -1.442695, %v2309_v62 }
 0x169   : > { %v2373_v43 = vpop.f32.mrb[31].mxu1  ;;  %v1697_v12 = vpop.eup %1696  ;;  %1071 = vst [vmem:[%s2267_s21 + $0x58] sm:$0xff] %v1695_v8  ;;  %1716 = vpow2.f32 %v1340_v32  ;;  %v1313_v8 = vmul.f32 -1.442695, %v2311_v1  ;;  %v1345_v56 = vmul.f32 -1.442695, %v2313_v4 }
 0x16a   : > { %v1699_v14 = vpop.eup %1698  ;;  %1103 = vst [vmem:[%s2267_s21 + $0x158] sm:$0xff] %v1697_v12  ;;  %1718 = vpow2.f32 %v1309_v3  ;;  %v1346_v62 = vmul.f32 -1.442695, %v2317_v10  ;;  %v1315_v1 = vmul.f32 -1.442695, %v2319_v13 }
 0x16b   : > { %v1701_v17 = vpop.eup %1700  ;;  %1072 = vst [vmem:[%s2267_s21 + $0x60] sm:$0xff] %v1699_v14  ;;  %1720 = vpow2.f32 %v1341_v39  ;;  %v1347_v4 = vmul.f32 -1.442695, %v2321_v16  ;;  %v1316_v9 = vmul.f32 -1.442695, %v2323_v23 }
 0x16c   : > { %v1703_v19 = vpop.eup %1702  ;;  %1104 = vst [vmem:[%s2267_s21 + $0x160] sm:$0xff] %v1701_v17  ;;  %1722 = vpow2.f32 %v1310_v40  ;;  %v1348_v10 = vmul.f32 -1.442695, %v2325_v24  ;;  %v1317_v13 = vmul.f32 -1.442695, %v2327_v29 }
 0x16d   : > { %v1705_v51 = vpop.eup %1704  ;;  %v881_v20 = vadd.f32 1.0, %v1703_v19  ;;  %1724 = vpow2.f32 %v1342_v44  ;;  %v1349_v16 = vmul.f32 -1.442695, %v2329_v34 }
 0x16e   : > { %v1707_v21 = vpop.eup %1706  ;;  %v913_v25 = vadd.f32 1.0, %v1705_v51  ;;  %1726 = vpow2.f32 %v1311_v15 }
 0x16f   : > { %v1709_v26 = vpop.eup %1708  ;;  %1728 = vrcp.f32 %v881_v20  ;;  %v882_v52 = vadd.f32 1.0, %v1707_v21 }
 0x170   : > { %v1711_v30 = vpop.eup %1710  ;;  %1730 = vrcp.f32 %v913_v25  ;;  %v914_v33 = vadd.f32 1.0, %v1709_v26 }
 0x171   : > { %v1713_v35 = vpop.eup %1712  ;;  %1732 = vrcp.f32 %v882_v52  ;;  %v883_v55 = vadd.f32 1.0, %v1711_v30 }
 0x172   : > { %v1715_v36 = vpop.eup %1714  ;;  %1734 = vrcp.f32 %v914_v33  ;;  %v915_v37 = vadd.f32 1.0, %v1713_v35 }
 0x173   : > { %v1717_v38 = vpop.eup %1716  ;;  %1736 = vrcp.f32 %v883_v55  ;;  %v884_v41 = vadd.f32 1.0, %v1715_v36 }
 0x174   : > { %v1719_v42 = vpop.eup %1718  ;;  %1738 = vrcp.f32 %v915_v37  ;;  %v916_v47 = vadd.f32 1.0, %v1717_v38 }
 0x175   : > { %v1721_v48 = vpop.eup %1720  ;;  %1740 = vrcp.f32 %v884_v41  ;;  %v885_v18 = vadd.f32 1.0, %v1719_v42 }
 0x176   : > { %v1723_v22 = vpop.eup %1722  ;;  %1742 = vrcp.f32 %v916_v47  ;;  %v917_v53 = vadd.f32 1.0, %v1721_v48 }
 0x177   : > { %v1725_v54 = vpop.eup %1724  ;;  %1744 = vrcp.f32 %v885_v18  ;;  %v886_v57 = vadd.f32 1.0, %v1723_v22 }
 0x178   : > { %v1727_v27 = vpop.eup %1726  ;;  %1746 = vrcp.f32 %v917_v53  ;;  %v918_v60 = vadd.f32 1.0, %v1725_v54 }
 0x179   : > { %v1729_v31 = vpop.eup %1728  ;;  %1748 = vrcp.f32 %v886_v57  ;;  %v887_v32 = vadd.f32 1.0, %v1727_v27 }
 0x17a   : > { %v1731_v3 = vpop.eup %1730  ;;  %1073 = vst [vmem:[%s2267_s21 + $0x68] sm:$0xff] %v1729_v31  ;;  %1750 = vrcp.f32 %v918_v60 }
 0x17b   : > { %v1733_v39 = vpop.eup %1732  ;;  %1105 = vst [vmem:[%s2267_s21 + $0x168] sm:$0xff] %v1731_v3  ;;  %1752 = vrcp.f32 %v887_v32 }
 0x17c   : > { %v1735_v40 = vpop.eup %1734  ;;  %1074 = vst [vmem:[%s2267_s21 + $0x70] sm:$0xff] %v1733_v39  ;;  %1754 = vpow2.f32 %v1343_v28  ;;  %v1318_v28 = vmul.f32 -1.442695, %v2333_v45  ;;  %v1320_v45 = vmul.f32 -1.442695, %v2349_v58 }
 0x17d   : > { %v1737_v12 = vpop.eup %1736  ;;  %1106 = vst [vmem:[%s2267_s21 + $0x170] sm:$0xff] %v1735_v40  ;;  %1756 = vpow2.f32 %v1312_v2  ;;  %v1350_v2 = vmul.f32 -1.442695, %v2335_v46  ;;  %v1352_v46 = vmul.f32 -1.442695, %v2351_v59 }
 0x17e   : > { %v1739_v44 = vpop.eup %1738  ;;  %1075 = vst [vmem:[%s2267_s21 + $0x78] sm:$0xff] %v1737_v12  ;;  %1758 = vpow2.f32 %v1344_v5  ;;  %v1319_v5 = vmul.f32 -1.442695, %v2339_v49  ;;  %v1321_v49 = vmul.f32 -1.442695, %v2355_v63 }
 0x17f   : > { %v1741_v14 = vpop.eup %1740  ;;  %1107 = vst [vmem:[%s2267_s21 + $0x178] sm:$0xff] %v1739_v44  ;;  %1760 = vpow2.f32 %v1313_v8  ;;  %v1351_v8 = vmul.f32 -1.442695, %v2341_v50  ;;  %v1353_v50 = vmul.f32 -1.442695, %v2357_v0 }
 0x180   : > { %v1743_v15 = vpop.eup %1742  ;;  %1076 = vst [vmem:[%s2267_s21 + $0x80] sm:$0xff] %v1741_v14  ;;  %1762 = vpow2.f32 %v1345_v56  ;;  %v1322_v58 = vmul.f32 -1.442695, %v2365_v6  ;;  %v1354_v59 = vmul.f32 -1.442695, %v2367_v7 }
 0x181   : > { %v1745_v17 = vpop.eup %1744  ;;  %1108 = vst [vmem:[%s2267_s21 + $0x180] sm:$0xff] %v1743_v15  ;;  %1764 = vpow2.f32 %v1314_v61  ;;  %v1323_v14 = vmul.f32 -1.442695, %v2371_v11  ;;  %v1355_v0 = vmul.f32 -1.442695, %v2373_v43 }
 0x182   : > { %v1747_v19 = vpop.eup %1746  ;;  %1077 = vst [vmem:[%s2267_s21 + $0x88] sm:$0xff] %v1745_v17  ;;  %1766 = vpow2.f32 %v1346_v62 }
 0x183   : > { %v1749_v51 = vpop.eup %1748  ;;  %1109 = vst [vmem:[%s2267_s21 + $0x188] sm:$0xff] %v1747_v19  ;;  %1768 = vpow2.f32 %v1315_v1 }
 0x184   : > { %v1751_v20 = vpop.eup %1750  ;;  %1078 = vst [vmem:[%s2267_s21 + $0x90] sm:$0xff] %v1749_v51  ;;  %1770 = vpow2.f32 %v1347_v4 }
 0x185   : > { %v1753_v21 = vpop.eup %1752  ;;  %1110 = vst [vmem:[%s2267_s21 + $0x190] sm:$0xff] %v1751_v20  ;;  %1772 = vpow2.f32 %v1316_v9 }
 0x186   : > { %v1755_v23 = vpop.eup %1754  ;;  %1079 = vst [vmem:[%s2267_s21 + $0x98] sm:$0xff] %v1753_v21  ;;  %1774 = vpow2.f32 %v1348_v10 }
 0x187   : > { %v1757_v25 = vpop.eup %1756  ;;  %v919_v26 = vadd.f32 1.0, %v1755_v23  ;;  %1776 = vpow2.f32 %v1317_v13 }
 0x188   : > { %v1759_v24 = vpop.eup %1758  ;;  %v888_v52 = vadd.f32 1.0, %v1757_v25  ;;  %1778 = vpow2.f32 %v1349_v16 }
 0x189   : > { %v1761_v30 = vpop.eup %1760  ;;  %1780 = vrcp.f32 %v919_v26  ;;  %v920_v29 = vadd.f32 1.0, %v1759_v24 }
 0x18a   : > { %v1763_v33 = vpop.eup %1762  ;;  %1782 = vrcp.f32 %v888_v52  ;;  %v889_v35 = vadd.f32 1.0, %v1761_v30 }
 0x18b   : > { %v1765_v55 = vpop.eup %1764  ;;  %1784 = vrcp.f32 %v920_v29  ;;  %v921_v34 = vadd.f32 1.0, %v1763_v33 }
 0x18c   : > { %v1767_v36 = vpop.eup %1766  ;;  %1786 = vrcp.f32 %v889_v35  ;;  %v890_v37 = vadd.f32 1.0, %v1765_v55 }
 0x18d   : > { %v1769_v38 = vpop.eup %1768  ;;  %1788 = vrcp.f32 %v921_v34  ;;  %v922_v41 = vadd.f32 1.0, %v1767_v36 }
 0x18e   : > { %v1771_v42 = vpop.eup %1770  ;;  %1790 = vrcp.f32 %v890_v37  ;;  %v891_v47 = vadd.f32 1.0, %v1769_v38 }
 0x18f   : > { %v1773_v48 = vpop.eup %1772  ;;  %1792 = vrcp.f32 %v922_v41  ;;  %v923_v18 = vadd.f32 1.0, %v1771_v42 }
 0x190   : > { %v1775_v22 = vpop.eup %1774  ;;  %1794 = vrcp.f32 %v891_v47  ;;  %v892_v53 = vadd.f32 1.0, %v1773_v48 }
 0x191   : > { %v1777_v54 = vpop.eup %1776  ;;  %1796 = vrcp.f32 %v923_v18  ;;  %v924_v57 = vadd.f32 1.0, %v1775_v22 }
 0x192   : > { %v1779_v27 = vpop.eup %1778  ;;  %1798 = vrcp.f32 %v892_v53  ;;  %v893_v60 = vadd.f32 1.0, %v1777_v54 }
 0x193   : > { %v1781_v31 = vpop.eup %1780  ;;  %1800 = vrcp.f32 %v924_v57  ;;  %v925_v32 = vadd.f32 1.0, %v1779_v27 }
 0x194   : > { %v1783_v3 = vpop.eup %1782  ;;  %1111 = vst [vmem:[%s2267_s21 + $0x198] sm:$0xff] %v1781_v31  ;;  %1802 = vrcp.f32 %v893_v60 }
 0x195   : > { %v1785_v39 = vpop.eup %1784  ;;  %1080 = vst [vmem:[%s2267_s21 + $0xa0] sm:$0xff] %v1783_v3  ;;  %1804 = vrcp.f32 %v925_v32 }
 0x196   : > { %v1787_v40 = vpop.eup %1786  ;;  %1112 = vst [vmem:[%s2267_s21 + $0x1a0] sm:$0xff] %v1785_v39  ;;  %1806 = vpow2.f32 %v1318_v28 }
 0x197   : > { %v1789_v56 = vpop.eup %1788  ;;  %1081 = vst [vmem:[%s2267_s21 + $0xa8] sm:$0xff] %v1787_v40  ;;  %1808 = vpow2.f32 %v1350_v2 }
 0x198   : > { %v1791_v12 = vpop.eup %1790  ;;  %1113 = vst [vmem:[%s2267_s21 + $0x1a8] sm:$0xff] %v1789_v56  ;;  %1810 = vpow2.f32 %v1319_v5 }
 0x199   : > { %v1793_v61 = vpop.eup %1792  ;;  %1082 = vst [vmem:[%s2267_s21 + $0xb0] sm:$0xff] %v1791_v12  ;;  %1812 = vpow2.f32 %v1351_v8 }
 0x19a   : > { %v1795_v44 = vpop.eup %1794  ;;  %1114 = vst [vmem:[%s2267_s21 + $0x1b0] sm:$0xff] %v1793_v61  ;;  %1814 = vpow2.f32 %v1320_v45 }
 0x19b   : > { %v1797_v62 = vpop.eup %1796  ;;  %1083 = vst [vmem:[%s2267_s21 + $0xb8] sm:$0xff] %v1795_v44  ;;  %1816 = vpow2.f32 %v1352_v46 }
 0x19c   : > { %v1799_v63 = vpop.eup %1798  ;;  %1115 = vst [vmem:[%s2267_s21 + $0x1b8] sm:$0xff] %v1797_v62  ;;  %1818 = vpow2.f32 %v1321_v49 }
 0x19d   : > { %v1801_v1 = vpop.eup %1800  ;;  %1084 = vst [vmem:[%s2267_s21 + $0xc0] sm:$0xff] %v1799_v63  ;;  %1820 = vpow2.f32 %v1353_v50 }
 0x19e   : > { %v1803_v15 = vpop.eup %1802  ;;  %1116 = vst [vmem:[%s2267_s21 + $0x1c0] sm:$0xff] %v1801_v1  ;;  %1822 = vpow2.f32 %v1322_v58 }
 0x19f   : > { %v1805_v6 = vpop.eup %1804  ;;  %1085 = vst [vmem:[%s2267_s21 + $0xc8] sm:$0xff] %v1803_v15  ;;  %1824 = vpow2.f32 %v1354_v59 }
 0x1a0   : > { %v1807_v4 = vpop.eup %1806  ;;  %1117 = vst [vmem:[%s2267_s21 + $0x1c8] sm:$0xff] %v1805_v6  ;;  %1826 = vpow2.f32 %v1323_v14 }
 0x1a1   : > { %v1809_v7 = vpop.eup %1808  ;;  %v894_v17 = vadd.f32 1.0, %v1807_v4  ;;  %1828 = vpow2.f32 %v1355_v0 }
 0x1a2   : > { %v1811_v9 = vpop.eup %1810  ;;  %v926_v19 = vadd.f32 1.0, %v1809_v7 }
 0x1a3   : > { %v1813_v11 = vpop.eup %1812  ;;  %1830 = vrcp.f32 %v894_v17  ;;  %v895_v10 = vadd.f32 1.0, %v1811_v9 }
 0x1a4   : > { %v1815_v51 = vpop.eup %1814  ;;  %1832 = vrcp.f32 %v926_v19  ;;  %v927_v43 = vadd.f32 1.0, %v1813_v11 }
 0x1a5   : > { %v1817_v13 = vpop.eup %1816  ;;  %1834 = vrcp.f32 %v895_v10  ;;  %v896_v20 = vadd.f32 1.0, %v1815_v51 }
 0x1a6   : > { %v1819_v16 = vpop.eup %1818  ;;  %1836 = vrcp.f32 %v927_v43  ;;  %v928_v21 = vadd.f32 1.0, %v1817_v13 }
 0x1a7   : > { %v1821_v23 = vpop.eup %1820  ;;  %1838 = vrcp.f32 %v896_v20  ;;  %v897_v25 = vadd.f32 1.0, %v1819_v16 }
 0x1a8   : > { %v1823_v26 = vpop.eup %1822  ;;  %1840 = vrcp.f32 %v928_v21  ;;  %v929_v24 = vadd.f32 1.0, %v1821_v23 }
 0x1a9   : > { %v1825_v52 = vpop.eup %1824  ;;  %1842 = vrcp.f32 %v897_v25  ;;  %v898_v30 = vadd.f32 1.0, %v1823_v26 }
 0x1aa   : > { %v1827_v29 = vpop.eup %1826  ;;  %1844 = vrcp.f32 %v929_v24  ;;  %v930_v33 = vadd.f32 1.0, %v1825_v52 }
 0x1ab   : > { %v1829_v35 = vpop.eup %1828  ;;  %1846 = vrcp.f32 %v898_v30  ;;  %v899_v55 = vadd.f32 1.0, %v1827_v29 }
 0x1ac   : > { %1848 = vrcp.f32 %v930_v33  ;;  %v931_v34 = vadd.f32 1.0, %v1829_v35 }
 0x1ad   : > { %v1831_v36 = vpop.eup %1830  ;;  %1850 = vrcp.f32 %v899_v55 }
 0x1ae   : > { %v1833_v37 = vpop.eup %1832  ;;  %1086 = vst [vmem:[%s2267_s21 + $0xd0] sm:$0xff] %v1831_v36  ;;  %1852 = vrcp.f32 %v931_v34 }
 0x1af   : > { %v1835_v38 = vpop.eup %1834  ;;  %1118 = vst [vmem:[%s2267_s21 + $0x1d0] sm:$0xff] %v1833_v37 }
 0x1b0   : > { %v1837_v41 = vpop.eup %1836  ;;  %1087 = vst [vmem:[%s2267_s21 + $0xd8] sm:$0xff] %v1835_v38 }
 0x1b1   : > { %v1839_v42 = vpop.eup %1838  ;;  %1119 = vst [vmem:[%s2267_s21 + $0x1d8] sm:$0xff] %v1837_v41 }
 0x1b2   : > { %v1841_v47 = vpop.eup %1840  ;;  %1088 = vst [vmem:[%s2267_s21 + $0xe0] sm:$0xff] %v1839_v42 }
 0x1b3   : > { %v1843_v48 = vpop.eup %1842  ;;  %1120 = vst [vmem:[%s2267_s21 + $0x1e0] sm:$0xff] %v1841_v47 }
 0x1b4   : > { %v1845_v18 = vpop.eup %1844  ;;  %1089 = vst [vmem:[%s2267_s21 + $0xe8] sm:$0xff] %v1843_v48 }
 0x1b5   : > { %v1847_v22 = vpop.eup %1846  ;;  %1121 = vst [vmem:[%s2267_s21 + $0x1e8] sm:$0xff] %v1845_v18 }
 0x1b6   : > { %v1849_v53 = vpop.eup %1848  ;;  %1090 = vst [vmem:[%s2267_s21 + $0xf0] sm:$0xff] %v1847_v22 }
 0x1b7   : > { %v1851_v54 = vpop.eup %1850  ;;  %1122 = vst [vmem:[%s2267_s21 + $0x1f0] sm:$0xff] %v1849_v53 }
 0x1b8   : > { %v1853_v57 = vpop.eup %1852  ;;  %1091 = vst [vmem:[%s2267_s21 + $0xf8] sm:$0xff] %v1851_v54 }
 0x1b9   : > { %1123 = vst [vmem:[%s2267_s21 + $0x1f8] sm:$0xff] %v1853_v57 }
 0x1ba   : > { %1867 = shalt.err (!%p1864_p6)
}
 0x1bb   : > { %s1868_s8 = scalar_lea.hbm %s2446_s30, 8192  ;;  %s1872_s21 = scalar_lea.hbm %s2510_s2, 32768 }
 0x1bc   : > { %p1869_p7 = scmp.ne.s32.totalorder %s2446_s30, %s1868_s8  ;;  %p1873_p11 = scmp.lt.u32.totalorder %s2446_s30, %s2510_s2 }
 0x1bd   : > { %p1874_p12 = scmp.lt.u32.totalorder %s1872_s21, %s1868_s8  ;;  %p1876_p0 = scmp.lt.u32.totalorder %s1868_s8, %s2446_s30 }
 0x1be   : > { %p1870_p9 = pnand %p1869_p7, %p2020_p3 }
 0x1bf   : > { %p1875_p13 = por %p1874_p12, %p1873_p11 }
 0x1c0   : > { %p1871_p10 = pneg %p1870_p9 }
 0x1c1   : > { %p1877_p1 = por %p1876_p0, %p1875_p13 }
 0x1c3   : > { %p1878_p2 = pnand %p1877_p1, %p1871_p10 }
 0x1c5   : > { %1881 = shalt.err (!%p1878_p2)
}
 0x1c6   : > { %s1951_s26 = smov 256   ;;  %s1952_s12 = smov 512  }
 0x1c7   : > { %s1953_s28 = smov 16  }
 0x1c8   : > { %1524 = dma.vmem_to_hbm [thread:$0]  (%p2020_p3), %s2449_s13, 8192, %s2446_s30, %s2456_s3, %s1951_s26, %s1952_s12, %s1953_s28  }
 0x1c9 PF: > { %p1530_p4 = scmp.ge.s32.totalorder %s1948_s16, 2  ;;  %s1156_s29 = sand.u32 1, %s1920_s9  }
 0x1ca   : > { %s1157_s4 = scalar_lea.sflag [#allocation3], %s1156_s29 }
 0x1cb   : > { %p1527_p5 = pnand %p1530_p4, %p2029_p8 }
 0x1cd   : > { %1915 = dma.done.wait (!%p1527_p5), %s1157_s4, 8192  }
 0x1ce   : > { %1917 = vsyncadd (!%p1527_p5), %s1157_s4, 4294959104  ;;  %s15_s16 = sadd.s32 1, %s1948_s16   ;;  %s2515_s9 = smov %s1924_s10 }
 0x1cf   : > { %p12_p6 = scmp.ge.s32.totalorder %s15_s16, 6   ;;  %s2516_s10 = smov %s1928_s11 }
 0x1d0   : > { %s2517_s11 = smov %s2038_s27  ;;  %s2518_s12 = smov %s1940_s14 }
 0x1d1   : > { %s2519_s13 = smov %s1944_s15  ;;  %s2520_s14 = smov %s2523_s19 }
 0x1d2   : > { %s2521_s15 = smov %s2527_s20  ;;  %14 = sbr.rel (!%p12_p6) target bundleno = 5 (0x5), region = 64 }
 0x1d9   :  { %1162 = vsyncpa [#allocation3], 1 }
 0x1da   :  { %1164 = vsyncpa [#allocation3 + $0x1], 1 }

</bundles_post_ra>
